<compile_context>
chip_gen: v7x
topology: tpu7x:2x2x1
jax: 0.10.0
libtpu: 0.0.40
codegen_flags: <defaults>
</compile_context>

<pallas_src>
from collections import defaultdict

import jax
import jax.numpy as jnp
from jax.experimental import pallas as pl
from jax.experimental.pallas import tpu as pltpu

LANE = 128      # lane width (last dim)
SUBPACK = 16    # bf16 sublane packing (second-to-last dim)
VMEM_LIMIT = 32 * 1024 * 1024   # safe on v5e/v6e (128 MiB) and v7x (64 MiB phys)


def _round_up(x, m):
    return ((x + m - 1) // m) * m


# --------------------- kernel 1: projection H = X @ W -----------------------

def project_kernel(x_ref, w_ref, h_ref):
    # bf16 x bf16 -> fp32 accumulate on the MXU, store lane-dense bf16.
    h_ref[...] = jnp.dot(x_ref[...], w_ref[...],
                         preferred_element_type=jnp.float32).astype(h_ref.dtype)


def project(x_pad, w_pad, tile_rows):
    """x_pad: (N_pad, C_in_pad) bf16, w_pad: (C_in_pad, C_out_pad) bf16."""
    n_rows, c_in = x_pad.shape
    c_out = w_pad.shape[1]
    grid = (n_rows // tile_rows,)
    return pl.pallas_call(
        project_kernel,
        out_shape=jax.ShapeDtypeStruct((n_rows, c_out), jnp.bfloat16),
        grid_spec=pltpu.PrefetchScalarGridSpec(
            num_scalar_prefetch=0,
            grid=grid,
            in_specs=[
                pl.BlockSpec((tile_rows, c_in), lambda i: (i, 0)),
                pl.BlockSpec((c_in, c_out), lambda i: (0, 0)),   # W resident
            ],
            out_specs=pl.BlockSpec((tile_rows, c_out), lambda i: (i, 0)),
        ),
        compiler_params=pltpu.CompilerParams(
            dimension_semantics=("parallel",),
            vmem_limit_bytes=VMEM_LIMIT,
        ),
        cost_estimate=pl.CostEstimate(
            flops=2 * n_rows * c_in * c_out,
            transcendentals=0,
            bytes_accessed=2 * (n_rows * c_in + c_in * c_out + n_rows * c_out),
        ),
    )(x_pad, w_pad)


# --------- kernel 2: fused  out = relu( A_cat @ H_cat )  (K-reduction) -------
# (1/div is already folded into A_cat, so the epilogue is just ReLU.)

def fused_agg_kernel(a_ref, h_ref, o_ref, acc_ref):
    k = pl.program_id(1)

    @pl.when(k == 0)
    def _():
        acc_ref[...] = jnp.zeros_like(acc_ref)

    acc_ref[...] += jnp.dot(a_ref[...], h_ref[...],
                            preferred_element_type=jnp.float32)

    @pl.when(k == pl.num_programs(1) - 1)
    def _():
        o_ref[...] = jnp.maximum(acc_ref[...], 0.0).astype(o_ref.dtype)


def aggregate(a_cat, h_cat, tile_dst, tile_src):
    """a_cat: (N_dst_pad, K_pad) bf16, h_cat: (K_pad, C_out_pad) bf16."""
    n_dst_pad, k_pad = a_cat.shape
    c_out_pad = h_cat.shape[1]
    grid = (n_dst_pad // tile_dst, k_pad // tile_src)
    return pl.pallas_call(
        fused_agg_kernel,
        out_shape=jax.ShapeDtypeStruct((n_dst_pad, c_out_pad), jnp.float32),
        grid_spec=pltpu.PrefetchScalarGridSpec(
            num_scalar_prefetch=0,
            grid=grid,
            in_specs=[
                pl.BlockSpec((tile_dst, tile_src), lambda i, k: (i, k)),
                pl.BlockSpec((tile_src, c_out_pad), lambda i, k: (k, 0)),
            ],
            out_specs=pl.BlockSpec((tile_dst, c_out_pad), lambda i, k: (i, 0)),
            scratch_shapes=[pltpu.VMEM((tile_dst, c_out_pad), jnp.float32)],
        ),
        compiler_params=pltpu.CompilerParams(
            dimension_semantics=("parallel", "arbitrary"),
            vmem_limit_bytes=VMEM_LIMIT,
        ),
        cost_estimate=pl.CostEstimate(
            flops=2 * n_dst_pad * k_pad * c_out_pad,
            transcendentals=0,
            bytes_accessed=(2 * n_dst_pad * k_pad          # A bf16
                            + 2 * k_pad * c_out_pad        # H bf16
                            + 4 * n_dst_pad * c_out_pad),  # out fp32
        ),
    )(a_cat, h_cat)


# ------------------------------ host-side glue -------------------------------

def glorot(key, shape):
    fan_out, fan_in = shape
    bound = (6.0 / (fan_in + fan_out)) ** 0.5
    return jax.random.uniform(key, shape, jnp.float32, -bound, bound)


def normalized_adjacency(src, dst, n_src, n_dst):
    """A[d, s] = (#edges s->d) / sqrt(deg_src(s) * deg_dst(d)); identical to the
    per-edge 1/sqrt(source_count*target_count) scatter-add in the reference."""
    deg_src = jnp.zeros((n_src,), jnp.float32).at[src].add(1.0)
    deg_dst = jnp.zeros((n_dst,), jnp.float32).at[dst].add(1.0)
    inv = 1.0 / jnp.sqrt(deg_src[src] * deg_dst[dst])
    return jnp.zeros((n_dst, n_src), jnp.float32).at[dst, src].add(inv)


class HeteroGCNConvPallas:
    def __init__(self, in_channels_dict, x_dict, edge_index_dict, out_channels, relu, key):
        self.out_channels = out_channels
        # Reference applies .relu() in the dict comprehension regardless of the
        # flag; the extra relu when ReLU=True is idempotent, so always-ReLU is exact.
        self.relu = relu
        self.c_out_pad = _round_up(out_channels, LANE)

        # padding/tiling per node type: (n, n_pad, tile_row, c_in_pad)
        self.node_pad = {}
        for t, c_in in in_channels_dict.items():
            n = x_dict[t].shape[0]
            tile_row = min(256, _round_up(n, SUBPACK))
            self.node_pad[t] = (n, _round_up(n, tile_row), tile_row, _round_up(c_in, LANE))

        # weights: fp32 masters in the PyTorch (C_out, C_in) layout (for the
        # reference check) + pre-transposed, padded bf16 copies for the kernel.
        # The reference's `__target` Linear only feeds a zeros_like template, so
        # it never affects the output and is not materialized here.
        self.weights = {}
        self.w_pad = {}
        self.div = defaultdict(int)
        keys = jax.random.split(key, len(edge_index_dict))
        for i, k in enumerate(edge_index_dict):
            name = "__".join(k)
            w = glorot(keys[i], (out_channels, in_channels_dict[k[0]]))
            self.weights[name + "__source"] = w
            c_in_pad = self.node_pad[k[0]][3]
            wp = jnp.zeros((c_in_pad, self.c_out_pad), jnp.float32)
            wp = wp.at[: w.shape[1], : w.shape[0]].set(w.T)     # pre-transposed
            self.w_pad[name] = wp.astype(jnp.bfloat16)
            self.div[k[-1]] += 1

        # Cached fused adjacency per destination type (graph static, like the
        # reference's div_all): per-edge-type normalized A's are padded,
        # concatenated along the source (K) axis, pre-scaled by 1/div_t, bf16.
        by_dst = defaultdict(list)
        for k in edge_index_dict:
            by_dst[k[-1]].append(k)
        self.edge_types_by_dst = {t: list(v) for t, v in by_dst.items()}

        self.a_cat = {}
        self.dst_meta = {}   # dst type -> (n_dst, n_dst_pad, tile_dst, k_pad, tile_src)
        for dst_t, ekeys in self.edge_types_by_dst.items():
            n_dst = x_dict[dst_t].shape[0]
            tile_dst = min(256, _round_up(n_dst, SUBPACK))
            n_dst_pad = _round_up(n_dst, tile_dst)
            blocks = []
            for k in ekeys:
                src_t = k[0]
                n_src, n_src_pad, _, _ = self.node_pad[src_t]
                a = normalized_adjacency(edge_index_dict[k][0], edge_index_dict[k][1],
                                         n_src, n_dst)
                a_pad = jnp.zeros((n_dst_pad, n_src_pad), jnp.float32)
                a_pad = a_pad.at[:n_dst, :n_src].set(a)
                blocks.append(a_pad)
            a_cat = jnp.concatenate(blocks, axis=1)
            k_cat = a_cat.shape[1]
            tile_src = min(512, _round_up(k_cat, LANE))
            k_pad = _round_up(k_cat, tile_src)
            if k_pad > k_cat:
                a_cat = jnp.concatenate(
                    [a_cat, jnp.zeros((n_dst_pad, k_pad - k_cat), jnp.float32)], axis=1)
            # fold the per-dst-type mean (1/div) into the cached A once, here:
            # no Python float baked into the kernel, no recompile across div values.
            a_cat = a_cat * (1.0 / float(self.div[dst_t]))
            self.a_cat[dst_t] = a_cat.astype(jnp.bfloat16)
            self.dst_meta[dst_t] = (n_dst, n_dst_pad, tile_dst, k_pad, tile_src)

    def __call__(self, x_dict, edge_index_dict):
        # NOTE: the graph is assumed static (same edge_index_dict as __init__),
        # matching the cached div_all of the reference; A is reused from cache.
        x_pad = {}
        for t, x in x_dict.items():
            n, n_pad, _, c_in_pad = self.node_pad[t]
            xp = jnp.zeros((n_pad, c_in_pad), jnp.float32).at[:n, : x.shape[1]].set(x)
            x_pad[t] = xp.astype(jnp.bfloat16)

        out = {}
        for dst_t, ekeys in self.edge_types_by_dst.items():
            n_dst, n_dst_pad, tile_dst, k_pad, tile_src = self.dst_meta[dst_t]
            h_blocks = []
            for k in ekeys:
                src_t = k[0]
                tile_row = self.node_pad[src_t][2]
                h_blocks.append(project(x_pad[src_t], self.w_pad["__".join(k)], tile_row))
            h_cat = jnp.concatenate(h_blocks, axis=0)
            if h_cat.shape[0] < k_pad:
                h_cat = jnp.concatenate(
                    [h_cat,
                     jnp.zeros((k_pad - h_cat.shape[0], self.c_out_pad), jnp.bfloat16)],
                    axis=0)
            y = aggregate(self.a_cat[dst_t], h_cat, tile_dst, tile_src)
            out[dst_t] = y[:n_dst, : self.out_channels]
        return out


# ------------------------------ reference (jnp) ------------------------------

def reference_forward(weights, div, x_dict, edge_index_dict):
    """Faithful fp32 edge-list gather/normalize/scatter-add, like the PyTorch module."""
    out = {}
    for k, v in edge_index_dict.items():
        src_t, dst_t = k[0], k[-1]
        src, dst = v[0], v[1]
        sx = x_dict[src_t] @ weights["__".join(k) + "__source"].T
        n_src = x_dict[src_t].shape[0]
        n_dst = x_dict[dst_t].shape[0]
        deg_src = jnp.zeros((n_src,), jnp.float32).at[src].add(1.0)
        deg_dst = jnp.zeros((n_dst,), jnp.float32).at[dst].add(1.0)
        div_e = jnp.sqrt(deg_src[src] * deg_dst[dst])
        msg = sx[src] / div_e[:, None]
        agg = jnp.zeros((n_dst, sx.shape[1]), jnp.float32).at[dst].add(msg)
        out[dst_t] = out.get(dst_t, jnp.zeros_like(agg)) + agg
    return {kk: jnp.maximum(vv / div[kk], 0.0) for kk, vv in out.items()}


# ---------------------------------- main -------------------------------------

if __name__ == "__main__":
    key = jax.random.PRNGKey(0)
    k_xu, k_xi, k_e1, k_e2, k_e3, k_w = jax.random.split(key, 6)

    n_user, n_item = 16, 24
    in_channels_dict = {"user": 8, "item": 12}
    out_channels = 32

    x_dict = {
        "user": jax.random.normal(k_xu, (n_user, 8), jnp.float32),
        "item": jax.random.normal(k_xi, (n_item, 12), jnp.float32),
    }

    def rand_edges(k, n_src, n_dst, n_edges):
        ks, kd = jax.random.split(k)
        src = jax.random.randint(ks, (n_edges,), 0, n_src, jnp.int32)
        dst = jax.random.randint(kd, (n_edges,), 0, n_dst, jnp.int32)
        return jnp.stack([src, dst], axis=0)   # (2, E), like torch edge_index

    edge_index_dict = {
        ("user", "rates", "item"): rand_edges(k_e1, n_user, n_item, 40),
        ("item", "rated_by", "user"): rand_edges(k_e2, n_item, n_user, 40),
        ("user", "follows", "user"): rand_edges(k_e3, n_user, n_user, 20),
    }

    conv = HeteroGCNConvPallas(in_channels_dict, x_dict, edge_index_dict,
                               out_channels, relu=True, key=k_w)

    out = conv(x_dict, edge_index_dict)
    out = jax.tree_util.tree_map(jax.block_until_ready, out)

    ref = reference_forward(conv.weights, conv.div, x_dict, edge_index_dict)
    for t in out:
        assert out[t].shape == (x_dict[t].shape[0], out_channels)
        # bf16 A/X/W/H with fp32 accumulation -> ~1e-2-level agreement vs fp32 ref
        assert jnp.allclose(out[t], ref[t], atol=5e-2, rtol=5e-2), f"mismatch for {t}"

    print("KERNEL_OK")
</pallas_src>

<mosaic_0001>
module attributes {stable_mosaic.version = 11 : i64} {
  func.func @project_kernel(%arg0: i32, %arg1: memref<16x128xbf16, #tpu.memory_space<vmem>>, %arg2: memref<128x128xbf16, #tpu.memory_space<vmem>>, %arg3: memref<16x128xbf16, #tpu.memory_space<vmem>>) attributes {dimension_semantics = [#tpu.dimension_semantics<parallel>], iteration_bounds = array<i64: 1>, scalar_prefetch = 0 : i64, scratch_operands = 0 : i64, tpu.core_type = #tpu.core_type<tc>, window_params = [{transform_indices = @transform_0, window_bounds = array<i64: 16, 128>}, {pipeline_mode = #tpu.pipeline_mode<synchronous>, transform_indices = @transform_1, window_bounds = array<i64: 128, 128>}, {transform_indices = @transform_2, window_bounds = array<i64: 16, 128>}]} {
    %c0 = arith.constant 0 : index
    %c0_0 = arith.constant 0 : index
    %0 = vector.load %arg1[%c0, %c0_0] : memref<16x128xbf16, #tpu.memory_space<vmem>>, vector<16x128xbf16>
    %c0_1 = arith.constant 0 : index
    %c0_2 = arith.constant 0 : index
    %1 = vector.load %arg2[%c0_1, %c0_2] : memref<128x128xbf16, #tpu.memory_space<vmem>>, vector<128x128xbf16>
    %cst = arith.constant dense<0.000000e+00> : vector<16x128xf32>
    %2 = tpu.matmul %0, %1, %cst {dimension_numbers = #tpu.dot_dimension_numbers<[1], [0], [0], [1], [0, 0, 1, 1], [], []>} : vector<16x128xbf16>, vector<128x128xbf16>, vector<16x128xf32> -> vector<16x128xf32>
    %3 = arith.truncf %2 : vector<16x128xf32> to vector<16x128xbf16>
    %c0_3 = arith.constant 0 : index
    %c0_4 = arith.constant 0 : index
    %4 = vector.load %arg3[%c0_3, %c0_4] : memref<16x128xbf16, #tpu.memory_space<vmem>>, vector<16x128xbf16>
    tpu.vector_store %arg3[%c0_3, %c0_4], %3 {strides = array<i32>} : memref<16x128xbf16, #tpu.memory_space<vmem>>, vector<16x128xbf16>,
    return
  }
  func.func @transform_0(%arg0: i32) -> (i32, i32) {
    %c0_i32 = arith.constant 0 : i32
    %c0_i32_0 = arith.constant 0 : i32
    return %arg0, %c0_i32 : i32, i32
  }
  func.func @transform_1(%arg0: i32) -> (i32, i32) {
    %c0_i32 = arith.constant 0 : i32
    %c0_i32_0 = arith.constant 0 : i32
    %c0_i32_1 = arith.constant 0 : i32
    return %c0_i32, %c0_i32_0 : i32, i32
  }
  func.func @transform_2(%arg0: i32) -> (i32, i32) {
    %c0_i32 = arith.constant 0 : i32
    %c0_i32_0 = arith.constant 0 : i32
    return %arg0, %c0_i32 : i32, i32
  }
}

</mosaic_0001>

<bundles_post_ra>
// kernel: tpu_custom_call.1
= control target key start
LH: loop header
LB: loop body
LE: loop exit
PB: predicated region body
PF: predicated region fallthrough
CT: control target
= control target key end

     0   :  { %7 = vsyncpa [#allocation3], 0  ;;  %s384_s0 = inlined_call_operand.hbm [shape: bf16[16,128], index: 0, kind: input, shape index: {}]   ;;  %s385_s1 = inlined_call_operand.hbm [shape: bf16[128,128], index: 1, kind: input, shape index: {}]   ;;  %s386_s2 = inlined_call_operand.hbm [shape: bf16[16,128], index: 2, kind: output, shape index: {}]  }
   0x1   :  { %8 = vsyncpa [#allocation6], 0 }
   0x2   :  { %9 = vsyncpa [#allocation4], 0  ;;  %s317_s9 = smov [#allocation2]   ;;  %s245_s13 = scalar_lea.hbm %s384_s0, 128 }
   0x3   :  { %s15_s10 = sshll.u32 %s317_s9, 4  ;;  %p246_p0 = scmp.ne.s32.totalorder %s384_s0, %s245_s13  ;;  %s16_s10 = int_to_ptr.vmem [resolvable:$true] %s15_s10 }
   0x4   :  { %p249_p1 = scmp.lt.u32.totalorder %s245_s13, %s384_s0 }
   0x6   :  { %p251_p2 = pnand %p249_p1, %p246_p0 }
   0x8   :  { %254 = shalt.err (!%p251_p2)
}
   0x9   :  { %s255_s18 = scalar_lea.vmem %s16_s10, 128  ;;  %p260_p4 = scmp.lt.s32.totalorder %s16_s10, %s16_s10 }
   0xa   :  { %p256_p3 = scmp.ne.s32.totalorder %s16_s10, %s255_s18  ;;  %p261_p5 = scmp.lt.s32.totalorder %s255_s18, %s255_s18 }
   0xc   :  { %p262_p6 = por %p261_p5, %p260_p4 }
   0xe   :  { %p263_p7 = pnand %p262_p6, %p256_p3 }
  0x10   :  { %266 = shalt.err (!%p263_p7)
}
  0x11   :  { %s318_s19 = smov 64   ;;  %s319_s20 = smov 4  }
  0x12   :  { %21 = dma.hbm_to_vmem [thread:$0]  %s384_s0, 128, %s16_s10, [#allocation3], %s318_s19, %s318_s19, %s319_s20  }
  0x13   :  { %s320_s23 = smov [#allocation5]   ;;  %s267_s27 = scalar_lea.hbm %s385_s1, 1024 }
  0x14   :  { %s27_s24 = sshll.u32 %s320_s23, 4  ;;  %p268_p8 = scmp.ne.s32.totalorder %s385_s1, %s267_s27  ;;  %s28_s24 = int_to_ptr.vmem [resolvable:$true] %s27_s24 }
  0x15   :  { %p271_p9 = scmp.lt.u32.totalorder %s267_s27, %s385_s1 }
  0x17   :  { %p273_p10 = pnand %p271_p9, %p268_p8 }
  0x19   :  { %276 = shalt.err (!%p273_p10)
}
  0x1a   :  { %s277_s4 = scalar_lea.vmem %s28_s24, 1024  ;;  %p282_p12 = scmp.lt.s32.totalorder %s28_s24, %s28_s24 }
  0x1b   :  { %p278_p11 = scmp.ne.s32.totalorder %s28_s24, %s277_s4  ;;  %p283_p13 = scmp.lt.s32.totalorder %s277_s4, %s277_s4 }
  0x1d   :  { %p284_p0 = por %p283_p13, %p282_p12 }
  0x1f   :  { %p285_p1 = pnand %p284_p0, %p278_p11 }
  0x21   :  { %288 = shalt.err (!%p285_p1)
}
  0x22   :  { %33 = dma.hbm_to_vmem [thread:$0]  %s385_s1, 1024, %s28_s24, [#allocation6], %s318_s19, %s318_s19, %s319_s20  }
  0x23   :  { %311 = dma.done.wait [#allocation3], 128  }
  0x24   :  { %312 = vsyncadd [#allocation3], 4294967168 }
  0x25   :  { %313 = dma.done.wait [#allocation6], 1024  }
  0x26   :  { %314 = vsyncadd [#allocation6], 4294966272  ;;  %v321_v0 = vmov 0.0   ;;  %vm322_vm0 = vmmov 0   ;;  %v236_v1 = vld [vmem:[#allocation5] sm:$0xff]   ;;  %v237_v2 = vld [vmem:[#allocation5 + $0x8] sm:$0xff]  }
  0x27   :  { %209 = vmatprep.subr.bf16.mxu0 %v321_v0  ;;  %225 = vmatprep.mubr.msk.bf16.mxu0 %vm322_vm0, %v321_v0  ;;  %v238_v3 = vld [vmem:[#allocation5 + $0x10] sm:$0xff]   ;;  %v239_v4 = vld [vmem:[#allocation5 + $0x18] sm:$0xff]   ;;  %v240_v5 = vld [vmem:[#allocation5 + $0x20] sm:$0xff]   ;;  %s323_s1 = smov [#allocation7]  }
  0x28   :  { %210 = vmatpush3.bf16.msra.mxu0 %v236_v1  ;;  %v241_v6 = vld [vmem:[#allocation5 + $0x28] sm:$0xff]   ;;  %v242_v7 = vld [vmem:[#allocation5 + $0x30] sm:$0xff]   ;;  %v243_v8 = vld [vmem:[#allocation5 + $0x38] sm:$0xff]   ;;  %s169_s6 = sshll.u32 %s323_s1, 4  ;;  %s170_s6 = int_to_ptr.vmem [resolvable:$true] %s169_s6 }
  0x29   :  { %211 = vmatprep.subr.bf16.mxu0 %v321_v0  ;;  %v244_v9 = vld [vmem:[#allocation2] sm:$0xff]   ;;  %s289_s7 = scalar_lea.vmem %s170_s6, 128  ;;  %p294_p3 = scmp.lt.s32.totalorder %s170_s6, %s170_s6 }
  0x2a   :  { %p290_p2 = scmp.ne.s32.totalorder %s170_s6, %s289_s7  ;;  %p295_p4 = scmp.lt.s32.totalorder %s289_s7, %s289_s7 }
  0x2c   :  { %212 = vmatpush3.bf16.msra.mxu0 %v237_v2  ;;  %p296_p5 = por %p295_p4, %p294_p3 }
  0x2d   :  { %213 = vmatprep.subr.bf16.mxu0 %v321_v0 }
  0x2e   :  { %p297_p6 = pnand %p296_p5, %p290_p2 }
  0x30   :  { %214 = vmatpush3.bf16.msra.mxu0 %v238_v3 }
  0x31   :  { %215 = vmatprep.subr.bf16.mxu0 %v321_v0 }
  0x34   :  { %216 = vmatpush3.bf16.msra.mxu0 %v239_v4 }
  0x35   :  { %217 = vmatprep.subr.bf16.mxu0 %v321_v0 }
  0x38   :  { %218 = vmatpush3.bf16.msra.mxu0 %v240_v5 }
  0x39   :  { %219 = vmatprep.subr.bf16.mxu0 %v321_v0 }
  0x3c   :  { %220 = vmatpush3.bf16.msra.mxu0 %v241_v6 }
  0x3d   :  { %221 = vmatprep.subr.bf16.mxu0 %v321_v0 }
  0x40   :  { %222 = vmatpush3.bf16.msra.mxu0 %v242_v7 }
  0x41   :  { %223 = vmatprep.subr.bf16.mxu0 %v321_v0 }
  0x44   :  { %224 = vmatpush3.bf16.msra.mxu0 %v243_v8 }
  0x47   :  { %226 = vmatmul.mubr.bf16.vlgmr.msra.gmra.mrb[0].mxu0 %v244_v9 }
 0x11a   :  { %v147_v10 = vpop.f32.mrb[0].mxu0 }
 0x11b   :  { %v227_v11 = vpop.f32.mrb[1].mxu0 }
 0x11c   :  { %v150_v12 = vpop.f32.mrb[2].mxu0 }
 0x11d   :  { %v198_v13 = vpack.c.bf16 %v150_v12, %v147_v10  ;;  %v228_v14 = vpop.f32.mrb[3].mxu0 }
 0x11f   :  { %199 = vst [vmem:[#allocation7] sm:$0xff] %v198_v13  }
 0x120   :  { %300 = shalt.err (!%p297_p6)
}
 0x121   :  { %s301_s10 = scalar_lea.hbm %s386_s2, 128 }
 0x122   :  { %p302_p7 = scmp.ne.s32.totalorder %s386_s2, %s301_s10  ;;  %p305_p8 = scmp.lt.u32.totalorder %s301_s10, %s386_s2 }
 0x124   :  { %p307_p9 = pnand %p305_p8, %p302_p7 }
 0x126   :  { %310 = shalt.err (!%p307_p9)
}
 0x127   :  { %175 = dma.vmem_to_hbm [thread:$0]  %s170_s6, 128, %s386_s2, [#allocation4], %s318_s19, %s318_s19, %s319_s20  }
 0x128   :  { %315 = dma.done.wait [#allocation4], 128  }
 0x129   :  { %316 = vsyncadd [#allocation4], 4294967168 }
 0x12a   :  { %179 = vsyncpa [#allocation3], 1 }
 0x12b   :  { %180 = vsyncpa [#allocation6], 1 }
 0x12c   :  { %181 = vsyncpa [#allocation4], 1 }

</bundles_post_ra>
